<compile_context>
chip_gen: v5e
topology: v5e:2x2
jax: 0.10.0
libtpu: 0.0.40
codegen_flags: <defaults>
</compile_context>

<pallas_src>
import jax
import jax.numpy as jnp
from jax.experimental import pallas as pl
from jax.experimental.pallas import tpu as pltpu


# ---------------------------------------------------------------------------
# Helpers
# ---------------------------------------------------------------------------
def _round_up(x, m):
    return (x + m - 1) // m * m


def _pad2d(a, rows, cols):
    pr, pc = rows - a.shape[0], cols - a.shape[1]
    if pr or pc:
        a = jnp.pad(a, ((0, pr), (0, pc)))
    return a


def _choose_div_tile(padded_dim, base, cap):
    """Largest multiple of `base` that is <= cap and divides `padded_dim`
    (padded_dim is itself a multiple of base).  Keeps pads/slices as no-ops
    whenever the problem is already aligned."""
    if padded_dim <= cap:
        return padded_dim
    t = (cap // base) * base
    while t > base:
        if padded_dim % t == 0:
            return t
        t -= base
    return base


def _vmem_capacity_bytes():
    try:
        return int(pltpu.get_tpu_info().vmem_capacity_bytes)
    except Exception:
        return 64 << 20            # conservative fallback (v7x-sized VMEM)


def _maybe_static_float(v):
    try:
        return float(v)            # concrete python / numpy / jnp scalar
    except Exception:
        return None                # traced value -> dynamic SMEM-scalar path


# Tile caps (all 256-multiples so large problems get MXU-friendly tiles;
# small dims just round up to (8,128)).  tn cap depends on VMEM capacity:
# v5e/v6e (128 MiB) can afford a wider N tile; v7x (64 MiB) prefers deep K.
_TM_CAP = 512
_TK_CAP = 1024
_TN_CAP = 1024 if _vmem_capacity_bytes() >= (96 << 20) else 512


# ---------------------------------------------------------------------------
# Kernels
# ---------------------------------------------------------------------------
def _apply_static_power(y, e):
    """y ** e with e a concrete Python float, specialized at trace time.
    Matches torch.pow: exact repeated multiply for integral e, NaN for
    negative bases with non-integral e."""
    if e == 1.0:
        return y
    if e == 0.0:
        return jnp.ones_like(y)
    if float(e).is_integer() and abs(int(e)) <= 64:
        n = abs(int(e))
        result = None
        base = y
        while n:
            if n & 1:
                result = base if result is None else result * base
            n >>= 1
            if n:
                base = base * base
        if e < 0:
            result = 1.0 / result
        return result
    # Non-integral exponent: exp(e*log(y)) -> NaN for y<0, like torch.pow.
    return jnp.exp(jnp.float32(e) * jnp.log(y))


def _make_static_kernel(static_exp):
    apply_power = (static_exp != 1.0)

    def kernel(x_ref, w_ref, b_ref, o_ref):
        k = pl.program_id(2)

        @pl.when(k == 0)
        def _init():
            # Fold the bias into the accumulator init (saves a VPU add later).
            o_ref[...] = jnp.broadcast_to(b_ref[...], o_ref.shape)

        # Accumulate directly into the resident f32 output block (no scratch).
        o_ref[...] += jnp.dot(x_ref[...], w_ref[...],
                              preferred_element_type=jnp.float32)

        if apply_power:
            @pl.when(k == pl.num_programs(2) - 1)
            def _finalize():
                o_ref[...] = _apply_static_power(o_ref[...], static_exp)

    return kernel


def _dynamic_kernel(scal_ref, x_ref, w_ref, b_ref, o_ref):
    """Runtime (traced) exponent.  scal_ref (SMEM f32[3]) = [e, is_int, is_odd]
    precomputed in the wrapper; negative bases with integral exponents are
    handled via |y|**e with an explicit sign fix (torch.pow semantics)."""
    k = pl.program_id(2)

    @pl.when(k == 0)
    def _init():
        o_ref[...] = jnp.broadcast_to(b_ref[...], o_ref.shape)

    o_ref[...] += jnp.dot(x_ref[...], w_ref[...],
                          preferred_element_type=jnp.float32)

    @pl.when(k == pl.num_programs(2) - 1)
    def _finalize():
        y = o_ref[...]
        e_v = jnp.full(y.shape, scal_ref[0], dtype=jnp.float32)
        is_int_v = jnp.full(y.shape, scal_ref[1], dtype=jnp.float32) > 0.5
        is_odd_v = jnp.full(y.shape, scal_ref[2], dtype=jnp.float32) > 0.5

        abs_y = jnp.abs(y)
        mag = jnp.exp(e_v * jnp.log(abs_y))                 # |y| ** e (EUP)
        # 0 ** e: 0 for e>0, 1 for e==0, inf for e<0 (torch.pow behaviour).
        zero_pow = jnp.where(e_v > 0.0, 0.0,
                             jnp.where(e_v == 0.0, 1.0, jnp.inf))
        mag = jnp.where(abs_y == 0.0, zero_pow, mag)

        signed = jnp.where(is_odd_v, -mag, mag)
        nan_v = jnp.full_like(mag, jnp.nan)
        neg_result = jnp.where(is_int_v, signed, nan_v)     # non-int & y<0 -> NaN
        o_ref[...] = jnp.where(y < 0.0, neg_result, mag)


# ---------------------------------------------------------------------------
# Forward wrapper
# ---------------------------------------------------------------------------
def _forward(x2, w_t_padded, b_padded, exponent, d_out):
    B, _ = x2.shape
    Kp, Np = w_t_padded.shape
    tn = _choose_div_tile(Np, 128, _TN_CAP)
    tk = _choose_div_tile(Kp, 128, _TK_CAP)

    Mp = _round_up(B, 8)
    tm = _choose_div_tile(Mp, 8, _TM_CAP)

    xp = _pad2d(jnp.asarray(x2, jnp.float32), Mp, Kp)

    m_blocks, n_blocks, k_blocks = Mp // tm, Np // tn, Kp // tk

    # Put the parallel axis with the most blocks first so both v7x TensorCores
    # (and megacore sharding generally) get work even when B <= tm.
    if n_blocks > m_blocks:
        grid = (n_blocks, m_blocks, k_blocks)
        x_spec = pl.BlockSpec((tm, tk), lambda j, i, k: (i, k))
        w_spec = pl.BlockSpec((tk, tn), lambda j, i, k: (k, j))
        b_spec = pl.BlockSpec((1, tn), lambda j, i, k: (0, j))
        o_spec = pl.BlockSpec((tm, tn), lambda j, i, k: (i, j))
    else:
        grid = (m_blocks, n_blocks, k_blocks)
        x_spec = pl.BlockSpec((tm, tk), lambda i, j, k: (i, k))
        w_spec = pl.BlockSpec((tk, tn), lambda i, j, k: (k, j))
        b_spec = pl.BlockSpec((1, tn), lambda i, j, k: (0, j))
        o_spec = pl.BlockSpec((tm, tn), lambda i, j, k: (i, j))

    static_exp = _maybe_static_float(exponent)
    uses_transcendental = (static_exp is None
                           or not float(static_exp).is_integer())

    cost = pl.CostEstimate(
        flops=2 * Mp * Kp * Np,
        transcendentals=(2 * Mp * Np if uses_transcendental else 0),
        # x streamed once per N-block, w once per M-block, plus bias + output.
        bytes_accessed=4 * (Mp * Kp * n_blocks + Kp * Np * m_blocks
                            + Np + Mp * Np),
    )

    # Double-buffered working set; raise the scoped-VMEM limit (v5e default is
    # only 16 MiB) but stay well inside every generation's physical VMEM.
    tile_bytes = 4 * 2 * (tm * tk + tk * tn + tm * tn + tn)
    vmem_limit = int(min(max(2 * tile_bytes, 32 << 20),
                         int(0.75 * _vmem_capacity_bytes())))
    compiler_params = pltpu.CompilerParams(
        dimension_semantics=("parallel", "parallel", "arbitrary"),
        vmem_limit_bytes=vmem_limit)

    common = dict(
        out_shape=jax.ShapeDtypeStruct((Mp, Np), jnp.float32),
        grid=grid,
        out_specs=o_spec,
        compiler_params=compiler_params,
        cost_estimate=cost,
    )

    if static_exp is not None:
        out = pl.pallas_call(
            _make_static_kernel(static_exp),
            in_specs=[x_spec, w_spec, b_spec],
            **common,
        )(xp, w_t_padded, b_padded)
    else:
        e = jnp.asarray(exponent, jnp.float32)
        e_round = jnp.round(e)
        is_int = (e == e_round).astype(jnp.float32)
        is_odd = (jnp.abs(jnp.remainder(e_round, 2.0)) > 0.5).astype(jnp.float32)
        scalars = jnp.stack([e, is_int, is_odd])            # SMEM f32[3]
        out = pl.pallas_call(
            _dynamic_kernel,
            in_specs=[pl.BlockSpec(memory_space=pltpu.MemorySpace.SMEM),
                      x_spec, w_spec, b_spec],
            **common,
        )(scalars, xp, w_t_padded, b_padded)

    if Mp != B or Np != d_out:
        out = out[:B, :d_out]
    return out


class PallasExampleModule:
    """Pallas port of ExampleModule: y = (x @ W^T + b) ** exponent."""

    def __init__(self, weight, bias, exponent=1.0):
        d_out, d_in = weight.shape
        self.d_in, self.d_out = d_in, d_out
        self.exponent = exponent
        kp = _round_up(d_in, 128)
        np_ = _round_up(d_out, 128)
        # Cache the (D_in, D_out)-layout, lane-padded weight & bias ONCE.
        self.w_t = _pad2d(jnp.asarray(weight, jnp.float32).T, kp, np_)
        self.b = _pad2d(jnp.asarray(bias, jnp.float32).reshape(1, d_out), 1, np_)

    def __call__(self, x, exponent=None):
        e = self.exponent if exponent is None else exponent
        lead = x.shape[:-1]
        x2 = x.reshape(-1, x.shape[-1])
        out = _forward(x2, self.w_t, self.b, e, self.d_out)
        return out.reshape(*lead, self.d_out)


# ---------------------------------------------------------------------------
# Demo / self-test
# ---------------------------------------------------------------------------
if __name__ == "__main__":
    batch, input_dims, output_dims = 8, 32, 16

    key = jax.random.PRNGKey(0)
    kx, kw, kb = jax.random.split(key, 3)

    x = jax.random.normal(kx, (batch, input_dims), dtype=jnp.float32)

    # PyTorch-style uniform(-1/sqrt(fan_in), 1/sqrt(fan_in)) init.
    bound = 1.0 / (input_dims ** 0.5)
    w = jax.random.uniform(kw, (output_dims, input_dims), jnp.float32, -bound, bound)
    b = jax.random.uniform(kb, (output_dims,), jnp.float32, -bound, bound)

    module = PallasExampleModule(w, b, exponent=1.0)

    ref_lin = jnp.dot(x, w.T, precision=jax.lax.Precision.HIGHEST) + b

    # 1) Default exponent 1.0 (module init value) -> power elided at trace time.
    out1 = jax.block_until_ready(module(x))
    assert out1.shape == (batch, output_dims)
    assert jnp.allclose(out1, ref_lin, atol=5e-3, rtol=5e-3)

    # 2) Static exponent 2.0 -> specialized to y*y on the VPU.
    out2 = jax.block_until_ready(module(x, exponent=2.0))
    assert jnp.allclose(out2, ref_lin ** 2, atol=5e-3, rtol=5e-3)

    # 3) Static exponent 3.0 (odd integer: exercises negative bases exactly).
    out3 = jax.block_until_ready(module(x, exponent=3.0))
    assert jnp.allclose(out3, ref_lin ** 3, atol=5e-3, rtol=5e-3)

    # 4) Dynamic (traced) exponent, as when the learned parameter flows under jit.
    dyn_fwd = jax.jit(lambda e: module(x, exponent=e))
    out4 = jax.block_until_ready(dyn_fwd(jnp.float32(1.0)))
    assert jnp.allclose(out4, ref_lin, atol=5e-3, rtol=5e-3)

    # 5) Dynamic exponent 2.0 with negative bases: torch.pow-compatible (no NaN).
    out5 = jax.block_until_ready(dyn_fwd(jnp.float32(2.0)))
    assert jnp.all(jnp.isfinite(out5))
    assert jnp.allclose(out5, ref_lin ** 2, atol=5e-3, rtol=5e-3)

    print("KERNEL_OK")
</pallas_src>

<mosaic_0001>
module attributes {stable_mosaic.version = 11 : i64} {
  func.func @kernel(%arg0: i32, %arg1: i32, %arg2: i32, %arg3: memref<8x128xf32, #tpu.memory_space<vmem>>, %arg4: memref<128x128xf32, #tpu.memory_space<vmem>>, %arg5: memref<1x128xf32, #tpu.memory_space<vmem>>, %arg6: memref<8x128xf32, #tpu.memory_space<vmem>>) attributes {dimension_semantics = [#tpu.dimension_semantics<parallel>, #tpu.dimension_semantics<parallel>, #tpu.dimension_semantics<arbitrary>], iteration_bounds = array<i64: 1, 1, 1>, scalar_prefetch = 0 : i64, scratch_operands = 0 : i64, tpu.core_type = #tpu.core_type<tc>, window_params = [{transform_indices = @transform_0, window_bounds = array<i64: 8, 128>}, {transform_indices = @transform_1, window_bounds = array<i64: 128, 128>}, {transform_indices = @transform_2, window_bounds = array<i64: 1, 128>}, {transform_indices = @transform_3, window_bounds = array<i64: 8, 128>}]} {
    %c0_i32 = arith.constant 0 : i32
    %0 = arith.cmpi eq, %arg2, %c0_i32 : i32
    %1 = arith.extui %0 : i1 to i32
    %c0_i32_0 = arith.constant 0 : i32
    %2 = arith.cmpi ne, %1, %c0_i32_0 : i32
    scf.if %2 {
      %c0_8 = arith.constant 0 : index
      %c0_9 = arith.constant 0 : index
      %9 = vector.load %arg5[%c0_8, %c0_9] : memref<1x128xf32, #tpu.memory_space<vmem>>, vector<1x128xf32>
      %10 = vector.shape_cast %9 : vector<1x128xf32> to vector<1x128xf32>
      %11 = vector.broadcast %10 : vector<1x128xf32> to vector<8x128xf32>
      %c0_10 = arith.constant 0 : index
      %c0_11 = arith.constant 0 : index
      %12 = vector.load %arg6[%c0_10, %c0_11] : memref<8x128xf32, #tpu.memory_space<vmem>>, vector<8x128xf32>
      tpu.vector_store %arg6[%c0_10, %c0_11], %11 {strides = array<i32>} : memref<8x128xf32, #tpu.memory_space<vmem>>, vector<8x128xf32>,
    } else {
    }
    %c0 = arith.constant 0 : index
    %c0_1 = arith.constant 0 : index
    %3 = vector.load %arg6[%c0, %c0_1] : memref<8x128xf32, #tpu.memory_space<vmem>>, vector<8x128xf32>
    %c0_2 = arith.constant 0 : index
    %c0_3 = arith.constant 0 : index
    %4 = vector.load %arg3[%c0_2, %c0_3] : memref<8x128xf32, #tpu.memory_space<vmem>>, vector<8x128xf32>
    %c0_4 = arith.constant 0 : index
    %c0_5 = arith.constant 0 : index
    %5 = vector.load %arg4[%c0_4, %c0_5] : memref<128x128xf32, #tpu.memory_space<vmem>>, vector<128x128xf32>
    %cst = arith.constant dense<0.000000e+00> : vector<8x128xf32>
    %6 = tpu.matmul %4, %5, %cst {dimension_numbers = #tpu.dot_dimension_numbers<[1], [0], [0], [1], [0, 0, 1, 1], [], []>} : vector<8x128xf32>, vector<128x128xf32>, vector<8x128xf32> -> vector<8x128xf32>
    %7 = arith.addf %3, %6 : vector<8x128xf32>
    %c0_6 = arith.constant 0 : index
    %c0_7 = arith.constant 0 : index
    %8 = vector.load %arg6[%c0_6, %c0_7] : memref<8x128xf32, #tpu.memory_space<vmem>>, vector<8x128xf32>
    tpu.vector_store %arg6[%c0_6, %c0_7], %7 {strides = array<i32>} : memref<8x128xf32, #tpu.memory_space<vmem>>, vector<8x128xf32>,
    return
  }
  func.func @transform_0(%arg0: i32, %arg1: i32, %arg2: i32) -> (i32, i32) {
    %c0_i32 = arith.constant 0 : i32
    return %arg0, %arg2 : i32, i32
  }
  func.func @transform_1(%arg0: i32, %arg1: i32, %arg2: i32) -> (i32, i32) {
    %c0_i32 = arith.constant 0 : i32
    return %arg2, %arg1 : i32, i32
  }
  func.func @transform_2(%arg0: i32, %arg1: i32, %arg2: i32) -> (i32, i32) {
    %c0_i32 = arith.constant 0 : i32
    %c0_i32_0 = arith.constant 0 : i32
    return %c0_i32, %arg1 : i32, i32
  }
  func.func @transform_3(%arg0: i32, %arg1: i32, %arg2: i32) -> (i32, i32) {
    %c0_i32 = arith.constant 0 : i32
    return %arg0, %arg1 : i32, i32
  }
}

</mosaic_0001>

<bundles_post_ra>
// kernel: tpu_custom_call.1
= control target key start
LH: loop header
LB: loop body
LE: loop exit
PB: predicated region body
PF: predicated region fallthrough
CT: control target
= control target key end

     0   :  { %8 = vsyncpa [#allocation3], 0  ;;  %s233_s0 = inlined_call_operand.hbm [shape: f32[8,128], index: 0, kind: input, shape index: {}]   ;;  %s234_s1 = inlined_call_operand.hbm [shape: f32[128,128], index: 1, kind: input, shape index: {}]   ;;  %s235_s2 = inlined_call_operand.vmem [shape: f32[1,128], index: 2, kind: input, shape index: {}]   ;;  %s236_s3 = inlined_call_operand.hbm [shape: f32[8,128], index: 3, kind: output, shape index: {}]  }
   0x1   :  { %9 = vsyncpa [#allocation6], 0 }
   0x2   :  { %10 = vsyncpa [#allocation4], 0  ;;  %s16_s14 = sshll.u32 %s233_s0, 4  ;;  %s196_s15 = smov [#allocation2]   ;;  %s17_s14 = int_to_ptr.hbm [resolvable:$true] %s16_s14 }
   0x3   :  { %s18_s16 = sshll.u32 %s196_s15, 4  ;;  %s26_s19 = sshll.u32 %s234_s1, 4  ;;  %s19_s16 = int_to_ptr.vmem [resolvable:$true] %s18_s16  ;;  %s27_s19 = int_to_ptr.hbm [resolvable:$true] %s26_s19 }
   0x4   :  { %21 = dma.hbm_to_vmem [thread:$0]  %s17_s14, 128, %s19_s16, [#allocation3]  }
   0x5   :  { %s197_s20 = smov [#allocation5]   ;;  %s198_s22 = smov 128  }
   0x6   :  { %s28_s21 = sshll.u32 %s197_s20, 4  ;;  %s199_s23 = smov 8   ;;  %s29_s21 = int_to_ptr.vmem [resolvable:$true] %s28_s21 }
   0x7   :  { %34 = dma.hbm_to_vmem [thread:$0]  %s27_s19, 2048, %s29_s21, [#allocation6], %s198_s22, %s198_s22, %s199_s23  }
   0x8   :  { %190 = dma.done.wait [#allocation3], 128  }
   0x9   :  { %191 = vsyncadd [#allocation3], 4294967168 }
   0xa   :  { %192 = dma.done.wait [#allocation6], 2048  }
   0xb   :  { %193 = vsyncadd [#allocation6], 4294965248  ;;  %v71_v0 = vld [vmem:[#allocation5 + $0x78] sm:$0xff]  ;;  %v70_v1 = vld [vmem:[#allocation5 + $0x70] sm:$0xff]  ;;  %s200_s24 = smov [#allocation7]   ;;  %s101_s28 = sshll.u32 %s236_s3, 4  ;;  %s102_s28 = int_to_ptr.hbm [resolvable:$true] %s101_s28 }
   0xc   :  { %72 = vmatpush.msra.mxu0 %v71_v0  ;;  %v69_v2 = vld [vmem:[#allocation5 + $0x68] sm:$0xff]  ;;  %v68_v3 = vld [vmem:[#allocation5 + $0x60] sm:$0xff]  ;;  %v67_v4 = vld [vmem:[#allocation5 + $0x58] sm:$0xff]  ;;  %s99_s25 = sshll.u32 %s200_s24, 4  ;;  %s100_s25 = int_to_ptr.vmem [resolvable:$true] %s99_s25 }
   0xd   :  { %v66_v5 = vld [vmem:[#allocation5 + $0x50] sm:$0xff]  ;;  %v65_v6 = vld [vmem:[#allocation5 + $0x48] sm:$0xff]  ;;  %v64_v7 = vld [vmem:[#allocation5 + $0x40] sm:$0xff] }
   0xe   :  { %73 = vmatpush.msra.mxu0 %v70_v1  ;;  %v63_v8 = vld [vmem:[#allocation5 + $0x38] sm:$0xff]  ;;  %v62_v9 = vld [vmem:[#allocation5 + $0x30] sm:$0xff]  ;;  %v61_v10 = vld [vmem:[#allocation5 + $0x28] sm:$0xff] }
   0xf   :  { %v60_v11 = vld [vmem:[#allocation5 + $0x20] sm:$0xff]  ;;  %v59_v12 = vld [vmem:[#allocation5 + $0x18] sm:$0xff]  ;;  %v58_v13 = vld [vmem:[#allocation5 + $0x10] sm:$0xff] }
  0x10   :  { %74 = vmatpush.msra.mxu0 %v69_v2  ;;  %v57_v14 = vld [vmem:[#allocation5 + $0x8] sm:$0xff]  ;;  %v56_v15 = vld [vmem:[#allocation5] sm:$0xff]  ;;  %v55_v16 = vld [vmem:[#allocation2] sm:$0xff] }
  0x11   :  { %v117_v17 = vld [vmem:[%s235_s2] ss:$0 sm:$0xff] }
  0x12   :  { %75 = vmatpush.msra.mxu0 %v68_v3 }
  0x14   :  { %76 = vmatpush.msra.mxu0 %v67_v4 }
  0x16   :  { %77 = vmatpush.msra.mxu0 %v66_v5 }
  0x18   :  { %78 = vmatpush.msra.mxu0 %v65_v6 }
  0x1a   :  { %79 = vmatpush.msra.mxu0 %v64_v7 }
  0x1c   :  { %80 = vmatpush.msra.mxu0 %v63_v8 }
  0x1e   :  { %81 = vmatpush.msra.mxu0 %v62_v9 }
  0x20   :  { %82 = vmatpush.msra.mxu0 %v61_v10 }
  0x22   :  { %83 = vmatpush.msra.mxu0 %v60_v11 }
  0x24   :  { %84 = vmatpush.msra.mxu0 %v59_v12 }
  0x26   :  { %85 = vmatpush.msra.mxu0 %v58_v13 }
  0x28   :  { %86 = vmatpush.msra.mxu0 %v57_v14 }
  0x2a   :  { %87 = vmatpush.msra.mxu0 %v56_v15 }
  0x2b   :  { %88 = vmatmul.f32.vlgmr.msra.gmra.mxu0 %v55_v16 }
  0xa8   :  { %v89_v18 = vpop.f32.mrf.mxu0 }
  0xa9   :  { %v92_v19 = vadd.f32 %v117_v17, %v89_v18 }
  0xab   :  { %93 = vst [vmem:[#allocation7] sm:$0xff] %v92_v19 }
  0xac   :  { %104 = dma.vmem_to_hbm [thread:$0]  %s100_s25, 128, %s102_s28, [#allocation4]  }
  0xad   :  { %194 = dma.done.wait [#allocation4], 128  }
  0xae   :  { %195 = vsyncadd [#allocation4], 4294967168 }
  0xaf   :  { %109 = vsyncpa [#allocation3], 1 }
  0xb0   :  { %110 = vsyncpa [#allocation6], 1 }
  0xb1   :  { %111 = vsyncpa [#allocation4], 1 }

</bundles_post_ra>
